<compile_context>
chip_gen: v7x
topology: tpu7x:2x2x1
jax: 0.10.0
libtpu: 0.0.40
codegen_flags: <defaults>
</compile_context>

<pallas_src>
import functools
from typing import NamedTuple

import jax
import jax.numpy as jnp
from jax.experimental import pallas as pl
from jax.experimental.pallas import tpu as pltpu

_LANE = 128
_SUBLANE = 8


def _round_up(n, m):
    return ((n + m - 1) // m) * m


def _device_kind():
    try:
        return jax.devices()[0].device_kind.lower()
    except Exception:
        return ""


def _is_v5e(kind):
    return ("v5e" in kind) or ("v5 lite" in kind) or ("v5litepod" in kind)


def _is_dual_core(kind):
    # v7x has 2 TensorCores per chip; v5e / v6e have 1.
    return "v7" in kind


def _vmem_capacity_bytes():
    try:
        return int(pltpu.get_tpu_info().vmem_capacity_bytes)
    except Exception:
        return 64 << 20  # conservative (v7x physical VMEM)


# --------------------------------------------------------------------------- #
# Kernel
# --------------------------------------------------------------------------- #
def _mlp_kernel(x_ref, w1_ref, b1_ref, w2_ref, b2_ref, o_ref, *,
                non_linearity, compute_dtype):
    # x_ref : (tm, D_in)          w1_ref: (D_in, H)          b1_ref: (1, H) f32
    # w2_ref: (H, D_out_pad)      b2_ref: (1, D_out_pad) f32 o_ref : (tm, D_out_pad)
    x = x_ref[...].astype(compute_dtype)     # only the small x tile is cast per step
    h = jnp.dot(x, w1_ref[...], preferred_element_type=jnp.float32)
    h = h + b1_ref[...]                      # bias add in f32
    if non_linearity == "relu":
        h = jnp.maximum(h, 0.0)
    elif non_linearity == "sigmoid":
        h = jax.nn.sigmoid(h)                # EUP transcendental, stays f32
    else:
        raise NotImplementedError(non_linearity)
    out = jnp.dot(h.astype(compute_dtype), w2_ref[...],
                  preferred_element_type=jnp.float32)
    out = out + b2_ref[...]
    o_ref[...] = out.astype(o_ref.dtype)


# --------------------------------------------------------------------------- #
# One-time parameter preparation (hoisted out of the per-call path)
# --------------------------------------------------------------------------- #
class ShallowFFNNParams(NamedTuple):
    w1_t: jax.Array        # (D_in, H)        compute dtype
    b1: jax.Array          # (1, H)           f32
    w2_t: jax.Array        # (H, D_out_pad)   compute dtype
    b2: jax.Array          # (1, D_out_pad)   f32
    d_out: int
    compute_dtype: object


def prepare_params(w1, b1, w2, b2, *, use_bf16_matmul=None):
    """One-time prep from torch nn.Linear layout:
    w1: (H, D_in); b1: (H,); w2: (D_out, H); b2: (D_out,)."""
    H, D_in = w1.shape
    D_out, h2 = w2.shape
    assert h2 == H and b1.shape == (H,) and b2.shape == (D_out,)

    if use_bf16_matmul is None:
        # v5e default: bf16 operands run the MXU at full rate and halve weight DMA.
        use_bf16_matmul = _is_v5e(_device_kind()) and w1.dtype == jnp.float32
    compute_dtype = jnp.bfloat16 if use_bf16_matmul else w1.dtype

    D_out_pad = _round_up(D_out, _LANE)
    if D_out_pad != D_out:
        w2 = jnp.pad(w2, ((0, D_out_pad - D_out), (0, 0)))

    w1_t = jnp.asarray(w1.T, compute_dtype)                     # (D_in, H)
    w2_t = jnp.asarray(w2.T, compute_dtype)                     # (H, D_out_pad)
    b1_2d = jnp.asarray(b1, jnp.float32).reshape(1, H)
    b2_2d = jnp.pad(jnp.asarray(b2, jnp.float32),
                    (0, D_out_pad - D_out)).reshape(1, D_out_pad)
    return ShallowFFNNParams(w1_t, b1_2d, w2_t, b2_2d, D_out, compute_dtype)


# --------------------------------------------------------------------------- #
# Tiling / VMEM budget
# --------------------------------------------------------------------------- #
def _pick_row_tile(batch, dual_core):
    if batch <= _SUBLANE:
        return batch                                   # full-dim block is legal
    if dual_core:
        # >= 4 grid steps (>= 2 per TensorCore) so each core still pipelines.
        return max(_SUBLANE, min(512, _round_up(pl.cdiv(batch, 4), _SUBLANE)))
    # Single TC (v5e/v6e): fewer, bigger tiles amortize the ~0.35us per-step cost
    # and give larger lane-dense stores.
    return max(_SUBLANE, min(1024, _round_up(batch, _SUBLANE)))


def _vmem_bytes(tm, d_in, h, d_out_pad, x_bytes, w_bytes, weight_buffers):
    weights = weight_buffers * ((d_in * h + h * d_out_pad) * w_bytes
                                + (h + d_out_pad) * 4)
    io = 2 * tm * (d_in + d_out_pad) * x_bytes          # double-buffered x / out
    return weights + io


# --------------------------------------------------------------------------- #
# Forward
# --------------------------------------------------------------------------- #
def shallow_ffnn_forward(x, params, *, non_linearity="relu", tm=None,
                         slice_output=True):
    """x: (B, D_in); params from prepare_params(). Returns (B, D_out)."""
    B, D_in = x.shape
    d_in2, H = params.w1_t.shape
    h2, D_out_pad = params.w2_t.shape
    assert d_in2 == D_in and h2 == H

    kind = _device_kind()
    if tm is None:
        tm = _pick_row_tile(B, _is_dual_core(kind))
    else:
        tm = max(1, min(int(tm), B))
        if tm < B:                                      # (8,128) rule on partial tiles
            tm = min(B, _round_up(tm, _SUBLANE))

    # ---- explicit VMEM budget (conservatively assume double-buffered weights) ----
    x_bytes = jnp.dtype(x.dtype).itemsize
    w_bytes = jnp.dtype(params.w1_t.dtype).itemsize
    vmem_cap = _vmem_capacity_bytes()
    headroom = 8 << 20
    needed = _vmem_bytes(tm, D_in, H, D_out_pad, x_bytes, w_bytes, 2)
    while needed + headroom > vmem_cap and tm > _SUBLANE:
        tm = max(_SUBLANE, _round_up(tm // 2, _SUBLANE))
        needed = _vmem_bytes(tm, D_in, H, D_out_pad, x_bytes, w_bytes, 2)
    if needed + headroom > vmem_cap:
        # TODO(synk): implement the K/N-tiled resident-weight variant for layers
        # whose weights exceed VMEM (first needed on v7x's 64 MiB).
        raise NotImplementedError(
            f"resident weights need ~{needed >> 20} MiB VMEM but only "
            f"{vmem_cap >> 20} MiB is available; K-tiled variant required")
    vmem_limit = int(min(vmem_cap, max(needed + headroom, 32 << 20)))

    grid = (pl.cdiv(B, tm),)                            # masked tail handles B % tm

    kernel = functools.partial(_mlp_kernel, non_linearity=non_linearity,
                               compute_dtype=params.compute_dtype)
    cost = pl.CostEstimate(
        flops=2 * B * (D_in * H + H * D_out_pad),
        transcendentals=B * H if non_linearity == "sigmoid" else 0,
        bytes_accessed=(B * D_in * x_bytes
                        + (D_in * H + H * D_out_pad) * w_bytes
                        + (H + D_out_pad) * 4
                        + B * D_out_pad * x_bytes))

    def build_call(single_buffer_weights):
        const_kw = (dict(pipeline_mode=pl.Buffered(1))
                    if single_buffer_weights else {})
        const_map = lambda i: (0, 0)
        in_specs = [
            pl.BlockSpec((tm, D_in), lambda i: (i, 0)),            # x tile
            pl.BlockSpec((D_in, H), const_map, **const_kw),        # W1^T (resident)
            pl.BlockSpec((1, H), const_map, **const_kw),           # b1
            pl.BlockSpec((H, D_out_pad), const_map, **const_kw),   # W2^T (resident)
            pl.BlockSpec((1, D_out_pad), const_map, **const_kw),   # b2
        ]
        out_specs = pl.BlockSpec((tm, D_out_pad), lambda i: (i, 0))
        return pl.pallas_call(
            kernel,
            out_shape=jax.ShapeDtypeStruct((B, D_out_pad), x.dtype),
            grid_spec=pltpu.PrefetchScalarGridSpec(
                num_scalar_prefetch=0, grid=grid,
                in_specs=in_specs, out_specs=out_specs),
            compiler_params=pltpu.CompilerParams(
                dimension_semantics=("parallel",),
                vmem_limit_bytes=vmem_limit),
            cost_estimate=cost,
        )

    args = (x, params.w1_t, params.b1, params.w2_t, params.b2)
    try:
        out = build_call(True)(*args)
    except (pltpu.LoweringException, TypeError, ValueError):
        # Narrow fallback: only a rejected Buffered(1) spec lands here; VMEM
        # capacity problems were already ruled out by the budget check above.
        out = build_call(False)(*args)

    if slice_output and D_out_pad != params.d_out:
        out = out[:, :params.d_out]
    return out


# --------------------------------------------------------------------------- #
# Demo / correctness check
# --------------------------------------------------------------------------- #
def _torch_linear_init(key, out_features, in_features, dtype=jnp.float32):
    """torch.nn.Linear default init: U(-1/sqrt(fan_in), 1/sqrt(fan_in))."""
    kw, kb = jax.random.split(key)
    bound = 1.0 / jnp.sqrt(jnp.array(in_features, dtype))
    w = jax.random.uniform(kw, (out_features, in_features), dtype,
                           minval=-bound, maxval=bound)
    b = jax.random.uniform(kb, (out_features,), dtype,
                           minval=-bound, maxval=bound)
    return w, b


if __name__ == "__main__":
    # Small shapes consistent with the module: batch=8, input=16, hidden=32, out=8.
    batch, input_dim, hidden_dim, output_dim = 8, 16, 32, 8

    key = jax.random.PRNGKey(0)
    kx, k1, k2 = jax.random.split(key, 3)

    x = jax.random.normal(kx, (batch, input_dim), jnp.float32)
    w1, b1 = _torch_linear_init(k1, hidden_dim, input_dim)
    w2, b2 = _torch_linear_init(k2, output_dim, hidden_dim)

    # One-time weight prep (transpose / pad / optional pre-cast), reused per call.
    params = prepare_params(w1, b1, w2, b2)
    bf16_path = params.compute_dtype == jnp.bfloat16
    tol = 3e-2 if bf16_path else 1e-4

    for nonlin in ("relu", "sigmoid"):
        out = shallow_ffnn_forward(x, params, non_linearity=nonlin)
        out = jax.block_until_ready(out)

        # Pure-JAX reference (same math as the PyTorch forward).
        h_ref = x @ w1.T + b1
        h_ref = jnp.maximum(h_ref, 0.0) if nonlin == "relu" else jax.nn.sigmoid(h_ref)
        ref = h_ref @ w2.T + b2

        assert out.shape == (batch, output_dim)
        assert jnp.allclose(out, ref, atol=tol, rtol=tol), \
            f"mismatch vs reference ({nonlin})"

    print("KERNEL_OK")
</pallas_src>

<mosaic_0001>
module attributes {stable_mosaic.version = 11 : i64} {
  func.func @_mlp_kernel(%arg0: i32, %arg1: memref<8x16xf32, #tpu.memory_space<vmem>>, %arg2: memref<16x32xf32, #tpu.memory_space<vmem>>, %arg3: memref<1x32xf32, #tpu.memory_space<vmem>>, %arg4: memref<32x128xf32, #tpu.memory_space<vmem>>, %arg5: memref<1x128xf32, #tpu.memory_space<vmem>>, %arg6: memref<8x128xf32, #tpu.memory_space<vmem>>) attributes {dimension_semantics = [#tpu.dimension_semantics<parallel>], iteration_bounds = array<i64: 1>, scalar_prefetch = 0 : i64, scratch_operands = 0 : i64, tpu.core_type = #tpu.core_type<tc>, window_params = [{transform_indices = @transform_0, window_bounds = array<i64: 8, 16>}, {pipeline_mode = #tpu.pipeline_mode<synchronous>, transform_indices = @transform_1, window_bounds = array<i64: 16, 32>}, {pipeline_mode = #tpu.pipeline_mode<synchronous>, transform_indices = @transform_2, window_bounds = array<i64: 1, 32>}, {pipeline_mode = #tpu.pipeline_mode<synchronous>, transform_indices = @transform_3, window_bounds = array<i64: 32, 128>}, {pipeline_mode = #tpu.pipeline_mode<synchronous>, transform_indices = @transform_4, window_bounds = array<i64: 1, 128>}, {transform_indices = @transform_5, window_bounds = array<i64: 8, 128>}]} {
    %c0 = arith.constant 0 : index
    %c0_0 = arith.constant 0 : index
    %0 = vector.load %arg1[%c0, %c0_0] : memref<8x16xf32, #tpu.memory_space<vmem>>, vector<8x16xf32>
    %c0_1 = arith.constant 0 : index
    %c0_2 = arith.constant 0 : index
    %1 = vector.load %arg2[%c0_1, %c0_2] : memref<16x32xf32, #tpu.memory_space<vmem>>, vector<16x32xf32>
    %cst = arith.constant dense<0.000000e+00> : vector<8x32xf32>
    %2 = tpu.matmul %0, %1, %cst {dimension_numbers = #tpu.dot_dimension_numbers<[1], [0], [0], [1], [0, 0, 1, 1], [], []>} : vector<8x16xf32>, vector<16x32xf32>, vector<8x32xf32> -> vector<8x32xf32>
    %c0_3 = arith.constant 0 : index
    %c0_4 = arith.constant 0 : index
    %3 = vector.load %arg3[%c0_3, %c0_4] : memref<1x32xf32, #tpu.memory_space<vmem>>, vector<1x32xf32>
    %4 = vector.broadcast %3 : vector<1x32xf32> to vector<8x32xf32>
    %5 = arith.addf %2, %4 : vector<8x32xf32>
    %cst_5 = arith.constant 0.000000e+00 : f32
    %6 = vector.broadcast %cst_5 : f32 to vector<8x32xf32>
    %7 = arith.maximumf %5, %6 : vector<8x32xf32>
    %c0_6 = arith.constant 0 : index
    %c0_7 = arith.constant 0 : index
    %8 = vector.load %arg4[%c0_6, %c0_7] : memref<32x128xf32, #tpu.memory_space<vmem>>, vector<32x128xf32>
    %cst_8 = arith.constant dense<0.000000e+00> : vector<8x128xf32>
    %9 = tpu.matmul %7, %8, %cst_8 {dimension_numbers = #tpu.dot_dimension_numbers<[1], [0], [0], [1], [0, 0, 1, 1], [], []>} : vector<8x32xf32>, vector<32x128xf32>, vector<8x128xf32> -> vector<8x128xf32>
    %c0_9 = arith.constant 0 : index
    %c0_10 = arith.constant 0 : index
    %10 = vector.load %arg5[%c0_9, %c0_10] : memref<1x128xf32, #tpu.memory_space<vmem>>, vector<1x128xf32>
    %11 = vector.broadcast %10 : vector<1x128xf32> to vector<8x128xf32>
    %12 = arith.addf %9, %11 : vector<8x128xf32>
    %c0_11 = arith.constant 0 : index
    %c0_12 = arith.constant 0 : index
    %13 = vector.load %arg6[%c0_11, %c0_12] : memref<8x128xf32, #tpu.memory_space<vmem>>, vector<8x128xf32>
    tpu.vector_store %arg6[%c0_11, %c0_12], %12 {strides = array<i32>} : memref<8x128xf32, #tpu.memory_space<vmem>>, vector<8x128xf32>,
    return
  }
  func.func @transform_0(%arg0: i32) -> (i32, i32) {
    %c0_i32 = arith.constant 0 : i32
    %c0_i32_0 = arith.constant 0 : i32
    return %arg0, %c0_i32 : i32, i32
  }
  func.func @transform_1(%arg0: i32) -> (i32, i32) {
    %c0_i32 = arith.constant 0 : i32
    %c0_i32_0 = arith.constant 0 : i32
    %c0_i32_1 = arith.constant 0 : i32
    return %c0_i32, %c0_i32_0 : i32, i32
  }
  func.func @transform_2(%arg0: i32) -> (i32, i32) {
    %c0_i32 = arith.constant 0 : i32
    %c0_i32_0 = arith.constant 0 : i32
    %c0_i32_1 = arith.constant 0 : i32
    return %c0_i32, %c0_i32_0 : i32, i32
  }
  func.func @transform_3(%arg0: i32) -> (i32, i32) {
    %c0_i32 = arith.constant 0 : i32
    %c0_i32_0 = arith.constant 0 : i32
    %c0_i32_1 = arith.constant 0 : i32
    return %c0_i32, %c0_i32_0 : i32, i32
  }
  func.func @transform_4(%arg0: i32) -> (i32, i32) {
    %c0_i32 = arith.constant 0 : i32
    %c0_i32_0 = arith.constant 0 : i32
    %c0_i32_1 = arith.constant 0 : i32
    return %c0_i32, %c0_i32_0 : i32, i32
  }
  func.func @transform_5(%arg0: i32) -> (i32, i32) {
    %c0_i32 = arith.constant 0 : i32
    %c0_i32_0 = arith.constant 0 : i32
    return %arg0, %c0_i32 : i32, i32
  }
}

</mosaic_0001>

<bundles_post_ra>
// kernel: tpu_custom_call.1
= control target key start
LH: loop header
LB: loop body
LE: loop exit
PB: predicated region body
PF: predicated region fallthrough
CT: control target
= control target key end

     0   :  { %10 = vsyncpa [#allocation3], 0  ;;  %s488_s0 = inlined_call_operand.hbm [shape: f32[8,16], index: 0, kind: input, shape index: {}]   ;;  %s489_s1 = inlined_call_operand.hbm [shape: f32[16,32], index: 1, kind: input, shape index: {}]   ;;  %s490_s2 = inlined_call_operand.vmem [shape: f32[1,32], index: 2, kind: input, shape index: {}]   ;;  %s491_s3 = inlined_call_operand.hbm [shape: f32[32,128], index: 3, kind: input, shape index: {}]   ;;  %s492_s4 = inlined_call_operand.vmem [shape: f32[1,128], index: 4, kind: input, shape index: {}]   ;;  %s493_s5 = inlined_call_operand.hbm [shape: f32[8,128], index: 5, kind: output, shape index: {}]  }
   0x1   :  { %11 = vsyncpa [#allocation6], 0 }
   0x2   :  { %12 = vsyncpa [#allocation4], 0  ;;  %s389_s18 = smov [#allocation5]   ;;  %s295_s22 = scalar_lea.hbm %s489_s1, 256 }
   0x3   :  { %s28_s19 = sshll.u32 %s389_s18, 4  ;;  %p296_p0 = scmp.ne.s32.totalorder %s489_s1, %s295_s22  ;;  %s29_s19 = int_to_ptr.vmem [resolvable:$true] %s28_s19 }
   0x4   :  { %p299_p1 = scmp.lt.u32.totalorder %s295_s22, %s489_s1 }
   0x6   :  { %p301_p2 = pnand %p299_p1, %p296_p0 }
   0x8   :  { %304 = shalt.err (!%p301_p2)
}
   0x9   :  { %s305_s27 = scalar_lea.vmem %s29_s19, 256  ;;  %p310_p4 = scmp.lt.s32.totalorder %s29_s19, %s29_s19 }
   0xa   :  { %p306_p3 = scmp.ne.s32.totalorder %s29_s19, %s305_s27  ;;  %p311_p5 = scmp.lt.s32.totalorder %s305_s27, %s305_s27 }
   0xc   :  { %p312_p6 = por %p311_p5, %p310_p4 }
   0xe   :  { %p313_p7 = pnand %p312_p6, %p306_p3 }
  0x10   :  { %316 = shalt.err (!%p313_p7)
}
  0x11   :  { %s390_s28 = smov 128   ;;  %s391_s29 = smov 8  }
  0x12   :  { %34 = dma.hbm_to_vmem [thread:$0]  %s489_s1, 256, %s29_s19, [#allocation6], %s390_s28, %s390_s28, %s391_s29  }
  0x13   :  { %s392_s7 = smov [#allocation2]   ;;  %s393_s9 = smov [#allocation7]  }
  0x14   :  { %s19_s8 = sshll.u32 %s392_s7, 4  ;;  %s42_s10 = sshll.u32 %s393_s9, 4  ;;  %s20_s8 = int_to_ptr.vmem [resolvable:$true] %s19_s8  ;;  %s43_s10 = int_to_ptr.vmem [resolvable:$true] %s42_s10 }
  0x15   :  { %s317_s13 = scalar_lea.hbm %s488_s0, 128 }
  0x16   :  { %p318_p8 = scmp.ne.s32.totalorder %s488_s0, %s317_s13  ;;  %p321_p9 = scmp.lt.u32.totalorder %s317_s13, %s488_s0 }
  0x18   :  { %p323_p10 = pnand %p321_p9, %p318_p8 }
  0x1a   :  { %326 = shalt.err (!%p323_p10)
}
  0x1b   :  { %s327_s1 = scalar_lea.vmem %s20_s8, 128  ;;  %p332_p12 = scmp.lt.s32.totalorder %s20_s8, %s20_s8 }
  0x1c   :  { %p328_p11 = scmp.ne.s32.totalorder %s20_s8, %s327_s1  ;;  %p333_p13 = scmp.lt.s32.totalorder %s327_s1, %s327_s1 }
  0x1e   :  { %p334_p0 = por %p333_p13, %p332_p12 }
  0x20   :  { %p335_p1 = pnand %p334_p0, %p328_p11 }
  0x22   :  { %338 = shalt.err (!%p335_p1)
}
  0x23   :  { %22 = dma.hbm_to_vmem [thread:$0]  %s488_s0, 128, %s20_s8, [#allocation3]  }
  0x24   :  { %s339_s22 = scalar_lea.hbm %s491_s3, 512 }
  0x25   :  { %p340_p2 = scmp.ne.s32.totalorder %s491_s3, %s339_s22  ;;  %p343_p3 = scmp.lt.u32.totalorder %s339_s22, %s491_s3 }
  0x27   :  { %p345_p4 = pnand %p343_p3, %p340_p2 }
  0x29   :  { %348 = shalt.err (!%p345_p4)
}
  0x2a   :  { %s349_s27 = scalar_lea.vmem %s43_s10, 512  ;;  %p354_p6 = scmp.lt.s32.totalorder %s43_s10, %s43_s10 }
  0x2b   :  { %p350_p5 = scmp.ne.s32.totalorder %s43_s10, %s349_s27  ;;  %p355_p7 = scmp.lt.s32.totalorder %s349_s27, %s349_s27 }
  0x2d   :  { %p356_p8 = por %p355_p7, %p354_p6 }
  0x2f   :  { %p357_p9 = pnand %p356_p8, %p350_p5 }
  0x31   :  { %360 = shalt.err (!%p357_p9)
}
  0x32   :  { %48 = dma.hbm_to_vmem [thread:$0]  %s491_s3, 512, %s43_s10, [#allocation6], %s390_s28, %s390_s28, %s391_s29  }
  0x33   :  { %383 = dma.done.wait [#allocation3], 128  }
  0x34   :  { %384 = vsyncadd [#allocation3], 4294967168 }
  0x35   :  { %385 = dma.done.wait [#allocation6], 768  }
  0x36   :  { %386 = vsyncadd [#allocation6], 4294966528  ;;  %v394_v0 = vmov 0.0|0.0   ;;  %vm395_vm0 = vmmov 0   ;;  %v396_v1 = vmov 0.0   ;;  %v61_v2 = vld [vmem:[#allocation5] sm:$0xff] }
  0x37   :  { %277 = vmatprep.subr.bf16.mxu0 %v394_v0  ;;  %263 = vmatprep.mubr.msk.f32.mxu0 %vm395_vm0, %v396_v1  ;;  %v62_v3 = vld [vmem:[#allocation5 + $0x8] sm:$0xff]  ;;  %v145_v5 = vld [vmem:[#allocation7] sm:$0xff]  ;;  %v146_v6 = vld [vmem:[#allocation7 + $0x8] sm:$0xff]  ;;  %vm70_vm1 = vcmask 130048   ;;  %vm156_vm2 = vcmask 261120   ;;  %s397_s7 = smov [#allocation8]  }
  0x38   :  { %280 = vmatprep.subr.bf16.mxu1 %v394_v0  ;;  %274 = vmatprep.mubr.msk.f32.mxu1 %vm395_vm0, %v396_v1  ;;  %v278_v4 = vpack.c.bf16 %v62_v3, %v61_v2  ;;  %v281_v7 = vpack.c.bf16 %v146_v6, %v145_v5  ;;  %v60_v8 = vld [vmem:[#allocation2] sm:$0xff]  ;;  %v147_v9 = vld [vmem:[#allocation7 + $0x10] sm:$0xff]  ;;  %v148_v10 = vld [vmem:[#allocation7 + $0x18] sm:$0xff]  ;;  %s237_s8 = sshll.u32 %s397_s7, 4  ;;  %s238_s8 = int_to_ptr.vmem [resolvable:$true] %s237_s8 }
  0x39   :  { %v284_v11 = vpack.c.bf16 %v148_v10, %v147_v9  ;;  %v247_v12 = vld [vmem:[%s490_s2] ss:$0 sm:$0xff]  ;;  %s361_s9 = scalar_lea.vmem %s238_s8, 128  ;;  %p366_p11 = scmp.lt.s32.totalorder %s238_s8, %s238_s8 }
  0x3a   :  { %279 = vmatpush3.bf16.msra.mxu0 %v278_v4  ;;  %282 = vmatpush3.bf16.msra.mxu1 %v281_v7  ;;  %v249_v17 = vld [vmem:[%s492_s4] ss:$0 sm:$0xff]  ;;  %p362_p10 = scmp.ne.s32.totalorder %s238_s8, %s361_s9  ;;  %p367_p12 = scmp.lt.s32.totalorder %s361_s9, %s361_s9 }
  0x3b   :  { %283 = vmatprep.subr.bf16.mxu1 %v394_v0 }
  0x3c   :  { %p368_p13 = por %p367_p12, %p366_p11 }
  0x3d   :  { %264 = vmatmul.mubr.msk.f32.vlgmr.msra.gmra.mrb[0].mxu0 %vm70_vm1, %v60_v8 }
  0x3e   :  { %285 = vmatpush3.bf16.msra.mxu1 %v284_v11  ;;  %p369_p0 = pnand %p368_p13, %p362_p10 }
 0x110   :  { %v140_v13 = vpop.f32.mrb[0].mxu0 }
 0x111   :  { %v141_v14 = vadd.f32 %v247_v12, %v140_v13  ;;  %v265_v15 = vpop.f32.mrb[1].mxu0 }
 0x113   :  { %v144_v16 = vmax.f32 %v141_v14, 0.0 }
 0x115   :  { %275 = vmatmul.mubr.msk.f32.vlgmr.msra.gmra.mrb[0].mxu1 %vm156_vm2, %v144_v16 }
 0x1e8   :  { %v226_v18 = vpop.f32.mrb[0].mxu1 }
 0x1e9   :  { %v227_v19 = vadd.f32 %v249_v17, %v226_v18  ;;  %v276_v20 = vpop.f32.mrb[1].mxu1 }
 0x1eb   :  { %230 = vst [vmem:[#allocation8] sm:$0xff] %v227_v19 }
 0x1ec   :  { %372 = shalt.err (!%p369_p0)
}
 0x1ed   :  { %s373_s11 = scalar_lea.hbm %s493_s5, 128 }
 0x1ee   :  { %p374_p1 = scmp.ne.s32.totalorder %s493_s5, %s373_s11  ;;  %p377_p2 = scmp.lt.u32.totalorder %s373_s11, %s493_s5 }
 0x1f0   :  { %p379_p3 = pnand %p377_p2, %p374_p1 }
 0x1f2   :  { %382 = shalt.err (!%p379_p3)
}
 0x1f3   :  { %240 = dma.vmem_to_hbm [thread:$0]  %s238_s8, 128, %s493_s5, [#allocation4]  }
 0x1f4   :  { %387 = dma.done.wait [#allocation4], 128  }
 0x1f5   :  { %388 = vsyncadd [#allocation4], 4294967168 }
 0x1f6   :  { %244 = vsyncpa [#allocation3], 1 }
 0x1f7   :  { %245 = vsyncpa [#allocation6], 1 }
 0x1f8   :  { %246 = vsyncpa [#allocation4], 1 }

</bundles_post_ra>
